<compile_context>
chip_gen: v5e
topology: v5e:2x2
jax: 0.10.0
libtpu: 0.0.40
codegen_flags: <defaults>
</compile_context>

<pallas_src>
import jax
import jax.numpy as jnp
from jax.experimental import pallas as pl
from jax.experimental.pallas import tpu as pltpu


def _copy_kernel(x_ref, o_ref):
    # Pure VMEM tile copy — the only work is HBM<->VMEM DMA.
    o_ref[...] = x_ref[...]


_LANE = 128
# Per-buffer VMEM budget. 2 inputs + 2 outputs double-buffered -> <= ~8 MiB.
_VMEM_BUDGET_PER_BUFFER = 2 * 1024 * 1024


def _choose_cols(total):
    """Largest lane-dense width (multiple of 128) that divides the element count."""
    for c in (16384, 8192, 4096, 2048, 1024, 512, 256, 128):
        if total % c == 0:
            return c
    return None


def _choose_row_tile(rows, cols, itemsize):
    """Row tile: multiple of sublane packing, <= VMEM budget, prefer dividing rows."""
    sub = max(1, 32 // itemsize)          # 8 for f32, 16 for bf16, 32 for int8/fp8
    cap = _VMEM_BUDGET_PER_BUFFER // max(1, cols * itemsize)
    cap = max(sub, (cap // sub) * sub)
    if rows <= cap:
        return rows                        # full extent — always legal
    for tr in range(cap, 0, -sub):         # prefer a tile that evenly divides rows
        if rows % tr == 0:
            return tr
    return cap                             # padded last block (harmless for a copy)


def _flatten_lane_dense(x):
    total = x.size
    cols = _choose_cols(total)
    if cols is not None:
        return x.reshape(total // cols, cols)
    # Fallback: keep original last dim (full-extent lane dim is always legal).
    last = x.shape[-1] if x.ndim >= 1 else 1
    last = max(1, last)
    return x.reshape(-1, last)


def _identity_pallas_2d(x2d, row_tile):
    rows, cols = x2d.shape
    nbytes = x2d.size * x2d.dtype.itemsize
    return pl.pallas_call(
        _copy_kernel,
        out_shape=jax.ShapeDtypeStruct((rows, cols), x2d.dtype),
        grid_spec=pltpu.PrefetchScalarGridSpec(
            num_scalar_prefetch=0,
            grid=(pl.cdiv(rows, row_tile),),
            in_specs=[pl.BlockSpec((row_tile, cols), lambda i: (i, 0))],
            out_specs=pl.BlockSpec((row_tile, cols), lambda i: (i, 0)),
        ),
        cost_estimate=pl.CostEstimate(
            flops=0, transcendentals=0, bytes_accessed=2 * nbytes),
        compiler_params=pltpu.CompilerParams(
            dimension_semantics=("parallel",),
        ),
    )(x2d)


def _forward_impl(x):
    if x.size == 0:
        return x
    x2d = _flatten_lane_dense(x)
    rows, cols = x2d.shape
    tr = _choose_row_tile(rows, cols, x2d.dtype.itemsize)
    y2d = _identity_pallas_2d(x2d, tr)
    return y2d.reshape(x.shape)


@jax.custom_vjp
def zero_gradient(x):
    """Forward: exact identity (Pallas copy). Backward: zero gradient."""
    return _forward_impl(x)


def _zg_fwd(x):
    return _forward_impl(x), None


def _zg_bwd(_, g):
    # Matches _ZeroGradient.backward: grad_output * 0.0
    return (jnp.zeros_like(g),)


zero_gradient.defvjp(_zg_fwd, _zg_bwd)


if __name__ == "__main__":
    key = jax.random.PRNGKey(0)
    # NCHW, small shapes: batch=2, channels=4, spatial=16
    x = jax.random.normal(key, (2, 4, 16, 16), dtype=jnp.float32)

    y = zero_gradient(x)
    jax.block_until_ready(y)

    # Forward must be the exact identity.
    assert y.shape == x.shape and y.dtype == x.dtype
    assert bool(jnp.all(y == x))

    # Backward must be exactly zero (ZeroGradient semantics).
    g = jax.grad(lambda t: jnp.sum(zero_gradient(t) ** 2))(x)
    jax.block_until_ready(g)
    assert bool(jnp.all(g == 0.0))

    print("KERNEL_OK")
</pallas_src>

<mosaic_0001>
module attributes {stable_mosaic.version = 11 : i64} {
  func.func @_copy_kernel(%arg0: i32, %arg1: memref<1x2048xf32, #tpu.memory_space<vmem>>, %arg2: memref<1x2048xf32, #tpu.memory_space<vmem>>) attributes {dimension_semantics = [#tpu.dimension_semantics<parallel>], iteration_bounds = array<i64: 1>, scalar_prefetch = 0 : i64, scratch_operands = 0 : i64, tpu.core_type = #tpu.core_type<tc>, window_params = [{transform_indices = @transform_0, window_bounds = array<i64: 1, 2048>}, {transform_indices = @transform_1, window_bounds = array<i64: 1, 2048>}]} {
    %c0 = arith.constant 0 : index
    %c0_0 = arith.constant 0 : index
    %0 = vector.load %arg1[%c0, %c0_0] : memref<1x2048xf32, #tpu.memory_space<vmem>>, vector<1x2048xf32>
    %c0_1 = arith.constant 0 : index
    %c0_2 = arith.constant 0 : index
    %1 = vector.load %arg2[%c0_1, %c0_2] : memref<1x2048xf32, #tpu.memory_space<vmem>>, vector<1x2048xf32>
    tpu.vector_store %arg2[%c0_1, %c0_2], %0 {strides = array<i32>} : memref<1x2048xf32, #tpu.memory_space<vmem>>, vector<1x2048xf32>,
    return
  }
  func.func @transform_0(%arg0: i32) -> (i32, i32) {
    %c0_i32 = arith.constant 0 : i32
    %c0_i32_0 = arith.constant 0 : i32
    return %arg0, %c0_i32 : i32, i32
  }
  func.func @transform_1(%arg0: i32) -> (i32, i32) {
    %c0_i32 = arith.constant 0 : i32
    %c0_i32_0 = arith.constant 0 : i32
    return %arg0, %c0_i32 : i32, i32
  }
}

</mosaic_0001>

<bundles_post_ra>
// kernel: tpu_custom_call.1
= control target key start
LH: loop header
LB: loop body
LE: loop exit
PB: predicated region body
PF: predicated region fallthrough
CT: control target
= control target key end

     0   :  { %6 = vsyncpa [#allocation3], 0  ;;  %s116_s0 = inlined_call_operand.hbm [shape: f32[1,2048], index: 0, kind: input, shape index: {}]   ;;  %s117_s1 = inlined_call_operand.hbm [shape: f32[1,2048], index: 1, kind: output, shape index: {}]  }
   0x1   :  { %7 = vsyncpa [#allocation4], 0  ;;  %s13_s8 = sshll.u32 %s116_s0, 4  ;;  %s98_s9 = smov [#allocation2]   ;;  %s14_s8 = int_to_ptr.hbm [resolvable:$true] %s13_s8 }
   0x2   :  { %s15_s10 = sshll.u32 %s98_s9, 4  ;;  %s16_s10 = int_to_ptr.vmem [resolvable:$true] %s15_s10 }
   0x3   :  { %18 = dma.hbm_to_vmem [thread:$0]  %s14_s8, 256, %s16_s10, [#allocation3]  }
   0x4   :  { %94 = dma.done.wait [#allocation3], 256  }
   0x5   :  { %95 = vsyncadd [#allocation3], 4294967040  ;;  %s99_s11 = smov [#allocation5]   ;;  %s34_s15 = sshll.u32 %s117_s1, 4  ;;  %v23_v0 = vld [vmem:[#allocation2] sm:$0xff]  ;;  %v24_v1 = vld [vmem:[#allocation2 + $0x8] sm:$0xff]  ;;  %s35_s15 = int_to_ptr.hbm [resolvable:$true] %s34_s15 }
   0x6   :  { %s32_s12 = sshll.u32 %s99_s11, 4  ;;  %25 = vst [vmem:[#allocation5] sm:$0xff] %v23_v0  ;;  %s33_s12 = int_to_ptr.vmem [resolvable:$true] %s32_s12 }
   0x7   :  { %26 = vst [vmem:[#allocation5 + $0x8] sm:$0xff] %v24_v1 }
   0x8   :  { %37 = dma.vmem_to_hbm [thread:$0]  %s33_s12, 256, %s35_s15, [#allocation4]  }
   0x9   :  { %96 = dma.done.wait [#allocation4], 256  }
   0xa   :  { %97 = vsyncadd [#allocation4], 4294967040 }
   0xb   :  { %42 = vsyncpa [#allocation3], 1 }
   0xc   :  { %43 = vsyncpa [#allocation4], 1 }

</bundles_post_ra>
